<compile_context>
chip_gen: v7x
topology: tpu7x:2x2x1
jax: 0.10.0
libtpu: 0.0.40
codegen_flags: <defaults>
</compile_context>

<pallas_src>
import copy
import functools
import warnings

import jax
import jax.numpy as jnp
from jax import lax
from jax.experimental import pallas as pl
from jax.experimental.pallas import tpu as pltpu


_LANES = 128
_SUBLANES = 8
_TILE_ROWS = 8192     # 8192 x 128 f32 = 4 MiB per DMA block (double-buffered)
_CHUNK_ROWS = 512     # in-kernel compute chunk: 256 KiB live temporaries


def _as_lane_rows(flat, pad_value):
    """Present a flat vector as a lane-dense (rows, 128) 2-D array.

    Pads only to the next 128-lane multiple (<128 elements) plus, for tiny
    inputs, up to 8 sublane rows — never to a tile multiple — so any input
    with numel % 128 == 0 is reshaped with ZERO HBM copies.
    """
    n = flat.size
    lane_pad = (-n) % _LANES
    rows = (n + lane_pad) // _LANES
    extra_rows = max(0, _SUBLANES - rows)
    pad = lane_pad + extra_rows * _LANES
    if pad:
        flat = jnp.pad(flat, (0, pad), constant_values=pad_value)
    return flat.reshape(rows + extra_rows, _LANES)


def _tiling(rows_arr, tile_rows):
    """Pick a (8-multiple) tile height <= rows_arr; last block may be partial."""
    tr = min(tile_rows, (rows_arr // _SUBLANES) * _SUBLANES)
    nk = -(-rows_arr // tr)
    need_mask = (rows_arr % tr) != 0
    return tr, nk, need_mask


# ---------------------------------------------------------------------------
# Kernel 1: fused elementwise loss + full reduction.
# Streams the image once; per-(sublane,lane) accumulation in (8,128) VMEM
# scratch; final cross-lane reduce + 1/n scale in-kernel -> SMEM scalars.
# ---------------------------------------------------------------------------
def _fused_loss_kernel(x_ref, mse_ref, l1_ref, mse_acc, l1_acc,
                       *, rows, tile_rows, inv_n, need_mask):
    k = pl.program_id(0)
    nk = pl.num_programs(0)

    @pl.when(k == 0)
    def _():
        mse_acc[...] = jnp.zeros_like(mse_acc)
        l1_acc[...] = jnp.zeros_like(l1_acc)

    def process(masked):
        # Chunked pass over the (tile_rows, 128) block: big DMA blocks, small
        # live vector temporaries.  Pure VPU adds; no per-tile XLU work.
        for s in range(0, tile_rows, _CHUNK_ROWS):
            c = min(_CHUNK_ROWS, tile_rows - s)
            x = x_ref[s:s + c, :].astype(jnp.float32)
            d = x - 0.5
            sq = d * d
            ab = jnp.abs(d)
            if masked:
                # Only out-of-bounds rows of the final partial block need
                # masking (lane-tail padding uses 0.5 and contributes 0).
                row = lax.broadcasted_iota(jnp.int32, (c, _LANES), 0)
                valid = (k * tile_rows + s + row) < rows
                sq = jnp.where(valid, sq, 0.0)
                ab = jnp.where(valid, ab, 0.0)
            mse_acc[...] += sq.reshape(c // _SUBLANES, _SUBLANES, _LANES).sum(axis=0)
            l1_acc[...] += ab.reshape(c // _SUBLANES, _SUBLANES, _LANES).sum(axis=0)

    if need_mask:
        @pl.when(k != nk - 1)
        def _():
            process(False)

        @pl.when(k == nk - 1)
        def _():
            process(True)
    else:
        process(False)

    @pl.when(k == nk - 1)
    def _():
        mse_ref[0] = jnp.sum(mse_acc[...]) * inv_n
        l1_ref[0] = jnp.sum(l1_acc[...]) * inv_n


def fused_loss_means(img, *, tile_rows=_TILE_ROWS):
    """One HBM pass over `img`: (mean((img-0.5)^2), mean(|img-0.5|))."""
    n = int(img.size)
    flat = img.reshape(-1)
    if not jnp.issubdtype(flat.dtype, jnp.floating):
        flat = flat.astype(jnp.float32)   # rare; keeps the 0.5 tail-pad exact

    x2d = _as_lane_rows(flat, pad_value=0.5)   # 0.5 pad => zero loss contribution
    rows_arr = x2d.shape[0]
    tr, nk, need_mask = _tiling(rows_arr, tile_rows)

    kernel = functools.partial(
        _fused_loss_kernel, rows=rows_arr, tile_rows=tr,
        inv_n=1.0 / n, need_mask=need_mask)

    mse, l1 = pl.pallas_call(
        kernel,
        out_shape=(jax.ShapeDtypeStruct((1,), jnp.float32),
                   jax.ShapeDtypeStruct((1,), jnp.float32)),
        grid_spec=pltpu.PrefetchScalarGridSpec(
            num_scalar_prefetch=0,
            grid=(nk,),
            in_specs=[pl.BlockSpec((tr, _LANES), lambda k: (k, 0))],
            out_specs=[
                pl.BlockSpec(memory_space=pltpu.MemorySpace.SMEM),
                pl.BlockSpec(memory_space=pltpu.MemorySpace.SMEM),
            ],
            scratch_shapes=[
                pltpu.VMEM((_SUBLANES, _LANES), jnp.float32),
                pltpu.VMEM((_SUBLANES, _LANES), jnp.float32),
            ]),
        compiler_params=pltpu.CompilerParams(
            dimension_semantics=("arbitrary",)),
    )(x2d)
    return mse[0], l1[0]


# ---------------------------------------------------------------------------
# Kernel 2: generic tiled mean (used by _parse_losses for any full tensor).
# ---------------------------------------------------------------------------
def _mean_kernel(x_ref, o_ref, acc_ref, *, rows, tile_rows, inv_n, need_mask):
    k = pl.program_id(0)
    nk = pl.num_programs(0)

    @pl.when(k == 0)
    def _():
        acc_ref[...] = jnp.zeros_like(acc_ref)

    def process(masked):
        for s in range(0, tile_rows, _CHUNK_ROWS):
            c = min(_CHUNK_ROWS, tile_rows - s)
            x = x_ref[s:s + c, :].astype(jnp.float32)
            if masked:
                row = lax.broadcasted_iota(jnp.int32, (c, _LANES), 0)
                x = jnp.where((k * tile_rows + s + row) < rows, x, 0.0)
            acc_ref[...] += x.reshape(c // _SUBLANES, _SUBLANES, _LANES).sum(axis=0)

    if need_mask:
        @pl.when(k != nk - 1)
        def _():
            process(False)

        @pl.when(k == nk - 1)
        def _():
            process(True)
    else:
        process(False)

    @pl.when(k == nk - 1)
    def _():
        o_ref[0] = jnp.sum(acc_ref[...]) * inv_n


def pallas_mean(x, *, tile_rows=_TILE_ROWS):
    """Mean of an arbitrary tensor via a tiled Pallas streaming reduction."""
    x = jnp.asarray(x)
    n = int(x.size)
    if n <= 1:
        return x.reshape(()).astype(jnp.float32)

    x2d = _as_lane_rows(x.reshape(-1), pad_value=0)   # zero pad: sum-preserving
    rows_arr = x2d.shape[0]
    tr, nk, need_mask = _tiling(rows_arr, tile_rows)

    kernel = functools.partial(
        _mean_kernel, rows=rows_arr, tile_rows=tr,
        inv_n=1.0 / n, need_mask=need_mask)

    out = pl.pallas_call(
        kernel,
        out_shape=jax.ShapeDtypeStruct((1,), jnp.float32),
        grid_spec=pltpu.PrefetchScalarGridSpec(
            num_scalar_prefetch=0,
            grid=(nk,),
            in_specs=[pl.BlockSpec((tr, _LANES), lambda k: (k, 0))],
            out_specs=pl.BlockSpec(memory_space=pltpu.MemorySpace.SMEM),
            scratch_shapes=[pltpu.VMEM((_SUBLANES, _LANES), jnp.float32)]),
        compiler_params=pltpu.CompilerParams(
            dimension_semantics=("arbitrary",)),
    )(x2d)
    return out[0]


# ---------------------------------------------------------------------------
# BaseModel re-implementation (no parameters in __init__, so none to create).
# ---------------------------------------------------------------------------
class BaseModel:
    def __init__(self, init_cfg=None):
        self._is_init = False
        self.init_cfg = copy.deepcopy(init_cfg)

    @property
    def is_init(self):
        return self._is_init

    def init_weights(self):
        # No parameters on BaseModel itself.
        if not self._is_init:
            self._is_init = True
        else:
            warnings.warn(
                f"init_weights of {self.__class__.__name__} has been called "
                "more than once.")

    # `forward_train` is abstract in the original; minimal synthetic impl so
    # that train_step / _parse_losses can execute end-to-end.  The fused
    # kernel reads the image once and returns scalar means directly, so no
    # full-size loss maps are ever written to / re-read from HBM.
    def forward_train(self, img, **kwargs):
        mse_mean, l1_mean = fused_loss_means(img)
        return {
            "loss_mse": mse_mean,       # tensor -> mean() in _parse_losses
            "loss_l1": [l1_mean],       # list of tensors -> sum of means
            "accuracy": mse_mean,       # non-'loss' key: logged, not summed
        }

    def forward_test(self, img, **kwargs):
        raise NotImplementedError

    def forward(self, mode="train", *args, **kwargs):
        if mode == "train":
            return self.forward_train(*args, **kwargs)
        elif mode == "test":
            return self.forward_test(*args, **kwargs)

    @staticmethod
    def _mean(v):
        # Pallas reduction for real tensors; already-scalar values are free.
        if v.size <= 1:
            return v.reshape(()).astype(jnp.float32)
        return pallas_mean(v)

    def _parse_losses(self, losses):
        log_vars = {}
        for loss_name, loss_value in losses.items():
            if isinstance(loss_value, jnp.ndarray):
                log_vars[loss_name] = self._mean(loss_value)
            elif isinstance(loss_value, float):
                log_vars[loss_name] = loss_value
            elif isinstance(loss_value, (list, tuple)):
                log_vars[loss_name] = sum(self._mean(v) for v in loss_value)
            else:
                raise TypeError(
                    "{} is not a tensor or list of tensors".format(loss_name))
        loss = sum(v for k, v in log_vars.items() if "loss" in k)
        # TODO(synk): torch.distributed all_reduce of log_vars has no
        # single-process Pallas equivalent; skipped (matches non-dist path).
        log_vars["loss"] = loss
        return loss, log_vars

    def train_step(self, data, optimizer=None):
        losses = self.forward(mode="train", **data)
        loss, log_vars = self._parse_losses(losses)
        num_samples = data["img"].shape[0]
        return dict(loss=loss, log_vars=log_vars, num_samples=num_samples)

    def val_step(self, data, optimizer=None):
        losses = self.forward(mode="train", **data)
        loss, log_vars = self._parse_losses(losses)
        return dict(loss=loss, log_vars=log_vars,
                    num_samples=data["img"].shape[0])

    def show_result(self, **kwargs):
        raise NotImplementedError


if __name__ == "__main__":
    key = jax.random.PRNGKey(0)
    img = jax.random.uniform(key, (2, 4, 16, 16), dtype=jnp.float32)

    model = BaseModel(init_cfg=None)
    model.init_weights()

    out = model.train_step({"img": img})
    loss = jax.block_until_ready(out["loss"])
    for v in out["log_vars"].values():
        jax.block_until_ready(v)

    # Cross-check against plain JAX reference of the same semantics.
    ref_mse = jnp.mean((img - 0.5) ** 2)
    ref_l1 = jnp.mean(jnp.abs(img - 0.5))
    ref_loss = ref_mse + ref_l1
    assert jnp.allclose(loss, ref_loss, rtol=1e-5, atol=1e-6)
    assert jnp.allclose(out["log_vars"]["loss_mse"], ref_mse, rtol=1e-5, atol=1e-6)
    assert jnp.allclose(out["log_vars"]["loss_l1"], ref_l1, rtol=1e-5, atol=1e-6)
    assert out["num_samples"] == 2

    # Non-lane-aligned image: exercises the tiny 0.5-pad + masked partial tile.
    img2 = jax.random.uniform(jax.random.PRNGKey(2), (2, 3, 15, 15),
                              dtype=jnp.float32)
    mse2, l12 = fused_loss_means(img2)
    jax.block_until_ready(mse2)
    assert jnp.allclose(mse2, jnp.mean((img2 - 0.5) ** 2), rtol=1e-5, atol=1e-6)
    assert jnp.allclose(l12, jnp.mean(jnp.abs(img2 - 0.5)), rtol=1e-5, atol=1e-6)

    # Generic Pallas mean on a non-tile-aligned tensor.
    t = jax.random.normal(jax.random.PRNGKey(1), (3, 5, 7), dtype=jnp.float32)
    assert jnp.allclose(jax.block_until_ready(pallas_mean(t)), jnp.mean(t),
                        rtol=1e-5, atol=1e-6)

    print("KERNEL_OK")
</pallas_src>

<mosaic_0001>
module attributes {stable_mosaic.version = 11 : i64} {
  func.func @_fused_loss_kernel(%arg0: i32, %arg1: memref<16x128xf32, #tpu.memory_space<vmem>>, %arg2: memref<1xf32, #tpu.memory_space<smem>>, %arg3: memref<1xf32, #tpu.memory_space<smem>>, %arg4: memref<8x128xf32, #tpu.memory_space<vmem>>, %arg5: memref<8x128xf32, #tpu.memory_space<vmem>>) attributes {dimension_semantics = [#tpu.dimension_semantics<arbitrary>], iteration_bounds = array<i64: 1>, scalar_prefetch = 0 : i64, scratch_operands = 2 : i64, tpu.core_type = #tpu.core_type<tc>, window_params = [{transform_indices = @transform_0, window_bounds = array<i64: 16, 128>}, {transform_indices = @transform_1, window_bounds = array<i64: 1>}, {transform_indices = @transform_2, window_bounds = array<i64: 1>}]} {
    %c0_i32 = arith.constant 0 : i32
    %0 = arith.cmpi eq, %arg0, %c0_i32 : i32
    %1 = arith.extui %0 : i1 to i32
    %c0_i32_0 = arith.constant 0 : i32
    %2 = arith.cmpi ne, %1, %c0_i32_0 : i32
    scf.if %2 {
      %cst_14 = arith.constant 0.000000e+00 : f32
      %21 = vector.broadcast %cst_14 : f32 to vector<8x128xf32>
      %c0_15 = arith.constant 0 : index
      %c0_16 = arith.constant 0 : index
      %22 = vector.load %arg4[%c0_15, %c0_16] : memref<8x128xf32, #tpu.memory_space<vmem>>, vector<8x128xf32>
      tpu.vector_store %arg4[%c0_15, %c0_16], %21 {strides = array<i32>} : memref<8x128xf32, #tpu.memory_space<vmem>>, vector<8x128xf32>,
      %cst_17 = arith.constant 0.000000e+00 : f32
      %23 = vector.broadcast %cst_17 : f32 to vector<8x128xf32>
      %c0_18 = arith.constant 0 : index
      %c0_19 = arith.constant 0 : index
      %24 = vector.load %arg5[%c0_18, %c0_19] : memref<8x128xf32, #tpu.memory_space<vmem>>, vector<8x128xf32>
      tpu.vector_store %arg5[%c0_18, %c0_19], %23 {strides = array<i32>} : memref<8x128xf32, #tpu.memory_space<vmem>>, vector<8x128xf32>,
    } else {
    }
    %c0 = arith.constant 0 : index
    %c0_1 = arith.constant 0 : index
    %3 = vector.load %arg1[%c0, %c0_1] : memref<16x128xf32, #tpu.memory_space<vmem>>, vector<16x128xf32>
    %cst = arith.constant 5.000000e-01 : f32
    %4 = vector.broadcast %cst : f32 to vector<16x128xf32>
    %5 = arith.subf %3, %4 : vector<16x128xf32>
    %6 = arith.mulf %5, %5 : vector<16x128xf32>
    %7 = math.absf %5 : vector<16x128xf32>
    %c0_2 = arith.constant 0 : index
    %c0_3 = arith.constant 0 : index
    %8 = vector.load %arg4[%c0_2, %c0_3] : memref<8x128xf32, #tpu.memory_space<vmem>>, vector<8x128xf32>
    %9 = vector.shape_cast %6 : vector<16x128xf32> to vector<2x8x128xf32>
    %cst_4 = arith.constant dense<0.000000e+00> : vector<8x128xf32>
    %10 = vector.multi_reduction <add>, %9, %cst_4 [0] : vector<2x8x128xf32> to vector<8x128xf32>
    %11 = arith.addf %8, %10 : vector<8x128xf32>
    %c0_5 = arith.constant 0 : index
    %c0_6 = arith.constant 0 : index
    %12 = vector.load %arg4[%c0_5, %c0_6] : memref<8x128xf32, #tpu.memory_space<vmem>>, vector<8x128xf32>
    tpu.vector_store %arg4[%c0_5, %c0_6], %11 {strides = array<i32>} : memref<8x128xf32, #tpu.memory_space<vmem>>, vector<8x128xf32>,
    %c0_7 = arith.constant 0 : index
    %c0_8 = arith.constant 0 : index
    %13 = vector.load %arg5[%c0_7, %c0_8] : memref<8x128xf32, #tpu.memory_space<vmem>>, vector<8x128xf32>
    %14 = vector.shape_cast %7 : vector<16x128xf32> to vector<2x8x128xf32>
    %cst_9 = arith.constant dense<0.000000e+00> : vector<8x128xf32>
    %15 = vector.multi_reduction <add>, %14, %cst_9 [0] : vector<2x8x128xf32> to vector<8x128xf32>
    %16 = arith.addf %13, %15 : vector<8x128xf32>
    %c0_10 = arith.constant 0 : index
    %c0_11 = arith.constant 0 : index
    %17 = vector.load %arg5[%c0_10, %c0_11] : memref<8x128xf32, #tpu.memory_space<vmem>>, vector<8x128xf32>
    tpu.vector_store %arg5[%c0_10, %c0_11], %16 {strides = array<i32>} : memref<8x128xf32, #tpu.memory_space<vmem>>, vector<8x128xf32>,
    %c0_i32_12 = arith.constant 0 : i32
    %18 = arith.cmpi eq, %arg0, %c0_i32_12 : i32
    %19 = arith.extui %18 : i1 to i32
    %c0_i32_13 = arith.constant 0 : i32
    %20 = arith.cmpi ne, %19, %c0_i32_13 : i32
    scf.if %20 {
      %c0_14 = arith.constant 0 : index
      %c0_15 = arith.constant 0 : index
      %21 = vector.load %arg4[%c0_14, %c0_15] : memref<8x128xf32, #tpu.memory_space<vmem>>, vector<8x128xf32>
      %22 = vector.shape_cast %21 : vector<8x128xf32> to vector<1x8x128xf32>
      %cst_16 = arith.constant dense<0.000000e+00> : vector<1xf32>
      %23 = vector.multi_reduction <add>, %22, %cst_16 [1, 2] : vector<1x8x128xf32> to vector<1xf32>
      %24 = vector.shape_cast %23 : vector<1xf32> to vector<1x1x1xf32>
      %25 = vector.extract %24[0, 0, 0] : f32 from vector<1x1x1xf32>
      %cst_17 = arith.constant 4.8828125E-4 : f32
      %26 = arith.mulf %25, %cst_17 : f32
      %c0_18 = arith.constant 0 : index
      %27 = memref.load %arg2[%c0_18] : memref<1xf32, #tpu.memory_space<smem>>
      memref.store %26, %arg2[%c0_18] : memref<1xf32, #tpu.memory_space<smem>>
      %c0_19 = arith.constant 0 : index
      %c0_20 = arith.constant 0 : index
      %28 = vector.load %arg5[%c0_19, %c0_20] : memref<8x128xf32, #tpu.memory_space<vmem>>, vector<8x128xf32>
      %29 = vector.shape_cast %28 : vector<8x128xf32> to vector<1x8x128xf32>
      %cst_21 = arith.constant dense<0.000000e+00> : vector<1xf32>
      %30 = vector.multi_reduction <add>, %29, %cst_21 [1, 2] : vector<1x8x128xf32> to vector<1xf32>
      %31 = vector.shape_cast %30 : vector<1xf32> to vector<1x1x1xf32>
      %32 = vector.extract %31[0, 0, 0] : f32 from vector<1x1x1xf32>
      %cst_22 = arith.constant 4.8828125E-4 : f32
      %33 = arith.mulf %32, %cst_22 : f32
      %c0_23 = arith.constant 0 : index
      %34 = memref.load %arg3[%c0_23] : memref<1xf32, #tpu.memory_space<smem>>
      memref.store %33, %arg3[%c0_23] : memref<1xf32, #tpu.memory_space<smem>>
    } else {
    }
    return
  }
  func.func @transform_0(%arg0: i32) -> (i32, i32) {
    %c0_i32 = arith.constant 0 : i32
    %c0_i32_0 = arith.constant 0 : i32
    return %arg0, %c0_i32 : i32, i32
  }
  func.func @transform_1(%arg0: i32) -> i32 {
    %c0_i32 = arith.constant 0 : i32
    %c0_i32_0 = arith.constant 0 : i32
    return %c0_i32 : i32
  }
  func.func @transform_2(%arg0: i32) -> i32 {
    %c0_i32 = arith.constant 0 : i32
    %c0_i32_0 = arith.constant 0 : i32
    return %c0_i32 : i32
  }
}

</mosaic_0001>

<bundles_post_ra>
// kernel: tpu_custom_call.1
= control target key start
LH: loop header
LB: loop body
LE: loop exit
PB: predicated region body
PF: predicated region fallthrough
CT: control target
= control target key end

     0   :  { %8 = vsyncpa [#allocation5], 0  ;;  %s218_s0 = inlined_call_operand.hbm [shape: f32[16,128], index: 0, kind: input, shape index: {}]   ;;  %s219_s1 = inlined_call_operand.hbm [shape: f32[1], index: 1, kind: output, shape index: {0}]   ;;  %s220_s2 = inlined_call_operand.hbm [shape: f32[1], index: 2, kind: output, shape index: {1}]  }
   0x1   :  { %9 = vsyncpa [#allocation6], 0 }
   0x2   :  { %10 = vsyncpa [#allocation9], 0  ;;  %s162_s9 = smov [#allocation4]   ;;  %s114_s13 = scalar_lea.hbm %s218_s0, 256 }
   0x3   :  { %s16_s10 = sshll.u32 %s162_s9, 4  ;;  %p115_p0 = scmp.ne.s32.totalorder %s218_s0, %s114_s13  ;;  %s17_s10 = int_to_ptr.vmem [resolvable:$true] %s16_s10 }
   0x4   :  { %p118_p1 = scmp.lt.u32.totalorder %s114_s13, %s218_s0 }
   0x6   :  { %p120_p2 = pnand %p118_p1, %p115_p0 }
   0x8   :  { %123 = shalt.err (!%p120_p2)
}
   0x9   :  { %s124_s18 = scalar_lea.vmem %s17_s10, 256  ;;  %p129_p4 = scmp.lt.s32.totalorder %s17_s10, %s17_s10 }
   0xa   :  { %p125_p3 = scmp.ne.s32.totalorder %s17_s10, %s124_s18  ;;  %p130_p5 = scmp.lt.s32.totalorder %s124_s18, %s124_s18 }
   0xc   :  { %p131_p6 = por %p130_p5, %p129_p4 }
   0xe   :  { %p132_p7 = pnand %p131_p6, %p125_p3 }
  0x10   :  { %135 = shalt.err (!%p132_p7)
}
  0x11   :  { %s163_s19 = smov 128   ;;  %s164_s20 = smov 8  }
  0x12   :  { %22 = dma.hbm_to_vmem [thread:$0]  %s218_s0, 256, %s17_s10, [#allocation5], %s163_s19, %s163_s19, %s164_s20  }
  0x13   :  { %156 = dma.done.wait [#allocation5], 256  }
  0x14   :  { %157 = vsyncadd [#allocation5], 4294967040  ;;  %v32_v0 = vld [vmem:[#allocation4] sm:$0xff]  ;;  %v33_v1 = vld [vmem:[#allocation4 + $0x8] sm:$0xff]  ;;  %s136_s28 = scalar_lea.hbm %s219_s1, 16 }
  0x15   :  { %v103_v2 = vadd.f32 -0.5, %v32_v0  ;;  %v104_v3 = vadd.f32 -0.5, %v33_v1  ;;  %p137_p8 = scmp.ne.s32.totalorder %s219_s1, %s136_s28  ;;  %p140_p9 = scmp.lt.u32.totalorder %s136_s28, %s219_s1 }
  0x17   :  { %v36_v4 = vmul.f32 %v103_v2, %v103_v2  ;;  %v37_v5 = vmul.f32 %v104_v3, %v104_v3  ;;  %v38_v6 = vand.u32 2147483647, %v103_v2  ;;  %v39_v7 = vand.u32 2147483647, %v104_v3  ;;  %p142_p10 = pnand %p140_p9, %p137_p8 }
  0x19   :  { %v41_v8 = vadd.f32 %v37_v5, %v36_v4  ;;  %v45_v9 = vadd.f32 %v39_v7, %v38_v6 }
  0x1b   :  { %52 = vadd.xlane.f32.xlu0 %v41_v8 }
  0x1f   :  { %65 = vadd.xlane.f32.xlu0 %v45_v9 }
  0xa8   :  { %v53_v10 = vpop.xlane.xlu0 %52 }
  0xa9   :  { %v54_v11 = vrot.slane %v53_v10, 4 }
  0xab   :  { %v55_v12 = vadd.f32 %v54_v11, %v53_v10 }
  0xac   :  { %v66_v13 = vpop.xlane.xlu0 %65 }
  0xad   :  { %v56_v14 = vrot.slane %v55_v12, 2  ;;  %v67_v15 = vrot.slane %v66_v13, 4 }
  0xaf   :  { %v68_v16 = vadd.f32 %v67_v15, %v66_v13  ;;  %v57_v17 = vadd.f32 %v56_v14, %v55_v12 }
  0xb1   :  { %v69_v18 = vrot.slane %v68_v16, 2  ;;  %v58_v19 = vrot.slane %v57_v17, 1 }
  0xb3   :  { %v70_v20 = vadd.f32 %v69_v18, %v68_v16  ;;  %v59_v21 = vadd.f32 %v58_v19, %v57_v17 }
  0xb5   :  { %105 = vpush %v59_v21  ;;  %v71_v22 = vrot.slane %v70_v20, 1 }
  0xb7   :  { %v72_v23 = vadd.f32 %v71_v22, %v70_v20 }
  0xb9   :  { %107 = vpush %v72_v23 }
  0xe6   :  { %s106_s0 = spop %105 }
  0xe7   :  { %s61_s23 = smul.f32 0.00048828125, %s106_s0 }
  0xe9   :  { %63 = sst [smem:[#allocation7]] %s61_s23 }
  0xea   :  { %s108_s24 = spop %107 }
  0xeb   :  { %s74_s25 = smul.f32 0.00048828125, %s108_s24 }
  0xec   :  { %145 = shalt.err (!%p142_p10)
}
  0xed   :  { %s165_s5 = smov [#allocation7]   ;;  %76 = sst [smem:[#allocation8]] %s74_s25 }
  0xee   :  { %84 = dma.smem_to_hbm %s165_s5, 16, %s219_s1, [#allocation6]  }
  0xef   :  { %s146_s10 = scalar_lea.hbm %s220_s2, 16 }
  0xf0   :  { %p147_p11 = scmp.ne.s32.totalorder %s220_s2, %s146_s10  ;;  %p150_p12 = scmp.lt.u32.totalorder %s146_s10, %s220_s2 }
  0xf2   :  { %p152_p13 = pnand %p150_p12, %p147_p11 }
  0xf4   :  { %155 = shalt.err (!%p152_p13)
}
  0xf5   :  { %s166_s15 = smov [#allocation8]  }
  0xf6   :  { %92 = dma.smem_to_hbm %s166_s15, 16, %s220_s2, [#allocation9]  }
  0xf7   :  { %158 = dma.done.wait [#allocation6], 16  }
  0xf8   :  { %159 = vsyncadd [#allocation6], 4294967280 }
  0xf9   :  { %160 = dma.done.wait [#allocation9], 16  }
  0xfa   :  { %161 = vsyncadd [#allocation9], 4294967280 }
  0xfb   :  { %99 = sfence }
  0xfc   :  { %100 = vsyncpa [#allocation5], 1 }
  0xfd   :  { %101 = vsyncpa [#allocation6], 1 }
  0xfe   :  { %102 = vsyncpa [#allocation9], 1 }

</bundles_post_ra>
